<compile_context>
chip_gen: v5e
topology: v5e:2x2
jax: 0.10.0
libtpu: 0.0.40
codegen_flags: <defaults>
</compile_context>

<pallas_src>
import jax
import jax.numpy as jnp
from jax.experimental import pallas as pl
from jax.experimental.pallas import tpu as pltpu


def _round_up(x, m):
    return (x + m - 1) // m * m


def _mlp_kernel(x_ref, wgu_ref, wd_ref, o_ref, acc_ref):
    # x_ref:   (tile_t, H)        token tile (resident across the k axis)
    # wgu_ref: (H, 2*tile_i)      fused [gate_k | up_k] weight tile
    # wd_ref:  (tile_i, H)        down_proj weight tile
    # o_ref:   (tile_t, H)        output tile (resident across the k axis)
    # acc_ref: (tile_t, H) f32    VMEM accumulator scratch
    k = pl.program_id(1)

    @pl.when(k == 0)
    def _init():
        acc_ref[...] = jnp.zeros_like(acc_ref)

    x = x_ref[...]
    # One MXU matmul produces both gate and up halves.
    gu = jnp.dot(x, wgu_ref[...], preferred_element_type=jnp.float32)
    ti = gu.shape[1] // 2
    gate = gu[:, :ti]
    up = gu[:, ti:]
    h = (gate * jax.nn.sigmoid(gate)) * up           # SiLU(gate) * up, in f32
    acc_ref[...] += jnp.dot(h.astype(x.dtype), wd_ref[...],
                            preferred_element_type=jnp.float32)

    @pl.when(k == pl.num_programs(1) - 1)
    def _finalize():
        o_ref[...] = acc_ref[...].astype(o_ref.dtype)


def deepseek_v3_mlp(x, w_gate, w_up, w_down, *, tile_t=256, tile_i=512):
    """down_proj(silu(gate_proj(x)) * up_proj(x)).

    x:      (..., H)
    w_gate: (H, I)   torch weight transposed to [in, out]
    w_up:   (H, I)
    w_down: (I, H)

    tile_t / tile_i are per-generation tuning knobs (tile_i up to 1024-2048 on
    v5e/v6e's 128 MiB VMEM; keep ~512 on v7x's 64 MiB).
    """
    orig_shape = x.shape
    H = orig_shape[-1]
    I = w_gate.shape[1]
    x2d = x.reshape(-1, H)
    T = x2d.shape[0]

    # ---- tile sizing: clamp for small shapes, align for real ones ----------
    if tile_t >= T:
        tile_t = _round_up(T, 8)
    else:
        tile_t = max(8, (tile_t // 8) * 8)
    if tile_i >= I:
        tile_i = I
    else:
        tile_i = max(128, (tile_i // 128) * 128)

    T_pad = _round_up(T, tile_t)
    I_pad = _round_up(I, tile_i)
    n_t = T_pad // tile_t
    n_k = I_pad // tile_i

    # ---- host-side padding (exact: silu(0)*0 == 0, zero rows of W_down) ----
    if T_pad != T:
        x2d = jnp.pad(x2d, ((0, T_pad - T), (0, 0)))
    if I_pad != I:
        w_gate = jnp.pad(w_gate, ((0, 0), (0, I_pad - I)))
        w_up = jnp.pad(w_up, ((0, 0), (0, I_pad - I)))
        w_down = jnp.pad(w_down, ((0, I_pad - I), (0, 0)))

    # ---- fuse gate/up, interleaved per intermediate tile --------------------
    # Contiguous block k of w_gu (width 2*tile_i) is [gate tile k | up tile k].
    w_gu = jnp.concatenate(
        [w_gate.reshape(H, n_k, tile_i), w_up.reshape(H, n_k, tile_i)],
        axis=2,
    ).reshape(H, 2 * I_pad)

    # ---- VMEM budget + cost estimate ----------------------------------------
    dt = jnp.dtype(x.dtype).itemsize
    vmem_bytes = (
        2 * tile_t * H * dt           # x tile (double-buffered)
        + 2 * H * 2 * tile_i * dt     # fused gate/up weight tile
        + 2 * tile_i * H * dt         # down-proj weight tile
        + 2 * tile_t * H * dt         # output tile
        + tile_t * H * 4              # f32 accumulator scratch
    )
    vmem_limit = int(min(128 * 1024 * 1024,
                         max(int(vmem_bytes * 1.5), 32 * 1024 * 1024)))

    cost = pl.CostEstimate(
        flops=6 * T * H * I,
        transcendentals=T * I,
        bytes_accessed=(T_pad * H                      # x in
                        + n_t * 3 * I_pad * H          # streamed weights
                        + T_pad * H) * dt,             # out
    )

    out = pl.pallas_call(
        _mlp_kernel,
        out_shape=jax.ShapeDtypeStruct((T_pad, H), x.dtype),
        grid_spec=pltpu.PrefetchScalarGridSpec(
            num_scalar_prefetch=0,
            grid=(n_t, n_k),                    # tokens, then reduction (last)
            in_specs=[
                pl.BlockSpec((tile_t, H), lambda i, k: (i, 0)),
                pl.BlockSpec((H, 2 * tile_i), lambda i, k: (0, k)),
                pl.BlockSpec((tile_i, H), lambda i, k: (k, 0)),
            ],
            out_specs=pl.BlockSpec((tile_t, H), lambda i, k: (i, 0)),
            scratch_shapes=[pltpu.VMEM((tile_t, H), jnp.float32)],
        ),
        compiler_params=pltpu.CompilerParams(
            dimension_semantics=("parallel", "arbitrary"),
            vmem_limit_bytes=vmem_limit,
        ),
        cost_estimate=cost,
    )(x2d, w_gu, w_down)

    if T_pad != T:
        out = out[:T]
    return out.reshape(orig_shape)


def _silu(v):
    return v * jax.nn.sigmoid(v)


def _reference_mlp(x, w_gate, w_up, w_down):
    # Pure-JAX reference mirroring the PyTorch forward.
    g = x @ w_gate
    u = x @ w_up
    return (_silu(g) * u) @ w_down


if __name__ == "__main__":
    key = jax.random.PRNGKey(0)

    def make_case(k, batch, seq, hidden, inter):
        kx, kg, ku, kd = jax.random.split(k, 4)
        x = jax.random.normal(kx, (batch, seq, hidden), dtype=jnp.float32)
        bh = 1.0 / (hidden ** 0.5)
        bi = 1.0 / (inter ** 0.5)
        wg = jax.random.uniform(kg, (hidden, inter), minval=-bh, maxval=bh,
                                dtype=jnp.float32)
        wu = jax.random.uniform(ku, (hidden, inter), minval=-bh, maxval=bh,
                                dtype=jnp.float32)
        wd = jax.random.uniform(kd, (inter, hidden), minval=-bi, maxval=bi,
                                dtype=jnp.float32)
        return x, wg, wu, wd

    k1, k2 = jax.random.split(key)

    # Case 1: small config-like shapes (batch=2, seq=8, hidden=32, inter=64).
    x, wg, wu, wd = make_case(k1, 2, 8, 32, 64)
    out = jax.block_until_ready(deepseek_v3_mlp(x, wg, wu, wd))
    ref = _reference_mlp(x.reshape(-1, 32), wg, wu, wd).reshape(x.shape)
    assert out.shape == x.shape
    assert jnp.allclose(out, ref, atol=1e-4, rtol=1e-4), "case1 mismatch"

    # Case 2: exercises token padding + multi-step intermediate reduction.
    x, wg, wu, wd = make_case(k2, 2, 24, 256, 512)
    out = jax.block_until_ready(
        deepseek_v3_mlp(x, wg, wu, wd, tile_t=32, tile_i=128))
    ref = _reference_mlp(x.reshape(-1, 256), wg, wu, wd).reshape(x.shape)
    assert out.shape == x.shape
    assert jnp.allclose(out, ref, atol=1e-4, rtol=1e-4), "case2 mismatch"

    print("KERNEL_OK")
</pallas_src>

<mosaic_0001>
module attributes {stable_mosaic.version = 11 : i64} {
  func.func @_mlp_kernel(%arg0: i32, %arg1: i32, %arg2: memref<16x32xf32, #tpu.memory_space<vmem>>, %arg3: memref<32x128xf32, #tpu.memory_space<vmem>>, %arg4: memref<64x32xf32, #tpu.memory_space<vmem>>, %arg5: memref<16x32xf32, #tpu.memory_space<vmem>>, %arg6: memref<16x32xf32, #tpu.memory_space<vmem>>) attributes {dimension_semantics = [#tpu.dimension_semantics<parallel>, #tpu.dimension_semantics<arbitrary>], iteration_bounds = array<i64: 1, 1>, scalar_prefetch = 0 : i64, scratch_operands = 1 : i64, tpu.core_type = #tpu.core_type<tc>, window_params = [{transform_indices = @transform_0, window_bounds = array<i64: 16, 32>}, {transform_indices = @transform_1, window_bounds = array<i64: 32, 128>}, {transform_indices = @transform_2, window_bounds = array<i64: 64, 32>}, {transform_indices = @transform_3, window_bounds = array<i64: 16, 32>}]} {
    %c0_i32 = arith.constant 0 : i32
    %0 = arith.cmpi eq, %arg1, %c0_i32 : i32
    %1 = arith.extui %0 : i1 to i32
    %c0_i32_0 = arith.constant 0 : i32
    %2 = arith.cmpi ne, %1, %c0_i32_0 : i32
    scf.if %2 {
      %cst_14 = arith.constant 0.000000e+00 : f32
      %23 = vector.broadcast %cst_14 : f32 to vector<16x32xf32>
      %c0_15 = arith.constant 0 : index
      %c0_16 = arith.constant 0 : index
      %24 = vector.load %arg6[%c0_15, %c0_16] : memref<16x32xf32, #tpu.memory_space<vmem>>, vector<16x32xf32>
      tpu.vector_store %arg6[%c0_15, %c0_16], %23 {strides = array<i32>} : memref<16x32xf32, #tpu.memory_space<vmem>>, vector<16x32xf32>,
    } else {
    }
    %c0 = arith.constant 0 : index
    %c0_1 = arith.constant 0 : index
    %3 = vector.load %arg2[%c0, %c0_1] : memref<16x32xf32, #tpu.memory_space<vmem>>, vector<16x32xf32>
    %c0_2 = arith.constant 0 : index
    %c0_3 = arith.constant 0 : index
    %4 = vector.load %arg3[%c0_2, %c0_3] : memref<32x128xf32, #tpu.memory_space<vmem>>, vector<32x128xf32>
    %cst = arith.constant dense<0.000000e+00> : vector<16x128xf32>
    %5 = tpu.matmul %3, %4, %cst {dimension_numbers = #tpu.dot_dimension_numbers<[1], [0], [0], [1], [0, 0, 1, 1], [], []>} : vector<16x32xf32>, vector<32x128xf32>, vector<16x128xf32> -> vector<16x128xf32>
    %6 = vector.extract_strided_slice %5 {offsets = [0, 0], sizes = [16, 64], strides = [1, 1]} : vector<16x128xf32> to vector<16x64xf32>
    %7 = vector.extract_strided_slice %5 {offsets = [0, 64], sizes = [16, 64], strides = [1, 1]} : vector<16x128xf32> to vector<16x64xf32>
    %8 = arith.negf %6 : vector<16x64xf32>
    %9 = math.exp %8 : vector<16x64xf32>
    %cst_4 = arith.constant 1.000000e+00 : f32
    %10 = vector.broadcast %cst_4 : f32 to vector<16x64xf32>
    %11 = arith.addf %10, %9 : vector<16x64xf32>
    %12 = arith.divf %10, %11 : vector<16x64xf32>
    %13 = arith.mulf %6, %12 : vector<16x64xf32>
    %14 = arith.mulf %13, %7 : vector<16x64xf32>
    %c0_5 = arith.constant 0 : index
    %c0_6 = arith.constant 0 : index
    %15 = vector.load %arg6[%c0_5, %c0_6] : memref<16x32xf32, #tpu.memory_space<vmem>>, vector<16x32xf32>
    %c0_7 = arith.constant 0 : index
    %c0_8 = arith.constant 0 : index
    %16 = vector.load %arg4[%c0_7, %c0_8] : memref<64x32xf32, #tpu.memory_space<vmem>>, vector<64x32xf32>
    %cst_9 = arith.constant dense<0.000000e+00> : vector<16x32xf32>
    %17 = tpu.matmul %14, %16, %cst_9 {dimension_numbers = #tpu.dot_dimension_numbers<[1], [0], [0], [1], [0, 0, 1, 1], [], []>} : vector<16x64xf32>, vector<64x32xf32>, vector<16x32xf32> -> vector<16x32xf32>
    %18 = arith.addf %15, %17 : vector<16x32xf32>
    %c0_10 = arith.constant 0 : index
    %c0_11 = arith.constant 0 : index
    %19 = vector.load %arg6[%c0_10, %c0_11] : memref<16x32xf32, #tpu.memory_space<vmem>>, vector<16x32xf32>
    tpu.vector_store %arg6[%c0_10, %c0_11], %18 {strides = array<i32>} : memref<16x32xf32, #tpu.memory_space<vmem>>, vector<16x32xf32>,
    %c0_i32_12 = arith.constant 0 : i32
    %20 = arith.cmpi eq, %arg1, %c0_i32_12 : i32
    %21 = arith.extui %20 : i1 to i32
    %c0_i32_13 = arith.constant 0 : i32
    %22 = arith.cmpi ne, %21, %c0_i32_13 : i32
    scf.if %22 {
      %c0_14 = arith.constant 0 : index
      %c0_15 = arith.constant 0 : index
      %23 = vector.load %arg6[%c0_14, %c0_15] : memref<16x32xf32, #tpu.memory_space<vmem>>, vector<16x32xf32>
      %c0_16 = arith.constant 0 : index
      %c0_17 = arith.constant 0 : index
      %24 = vector.load %arg5[%c0_16, %c0_17] : memref<16x32xf32, #tpu.memory_space<vmem>>, vector<16x32xf32>
      tpu.vector_store %arg5[%c0_16, %c0_17], %23 {strides = array<i32>} : memref<16x32xf32, #tpu.memory_space<vmem>>, vector<16x32xf32>,
    } else {
    }
    return
  }
  func.func @transform_0(%arg0: i32, %arg1: i32) -> (i32, i32) {
    %c0_i32 = arith.constant 0 : i32
    %c0_i32_0 = arith.constant 0 : i32
    return %arg0, %c0_i32 : i32, i32
  }
  func.func @transform_1(%arg0: i32, %arg1: i32) -> (i32, i32) {
    %c0_i32 = arith.constant 0 : i32
    %c0_i32_0 = arith.constant 0 : i32
    return %c0_i32, %arg1 : i32, i32
  }
  func.func @transform_2(%arg0: i32, %arg1: i32) -> (i32, i32) {
    %c0_i32 = arith.constant 0 : i32
    %c0_i32_0 = arith.constant 0 : i32
    return %arg1, %c0_i32 : i32, i32
  }
  func.func @transform_3(%arg0: i32, %arg1: i32) -> (i32, i32) {
    %c0_i32 = arith.constant 0 : i32
    %c0_i32_0 = arith.constant 0 : i32
    return %arg0, %c0_i32 : i32, i32
  }
}

</mosaic_0001>

<bundles_post_ra>
// kernel: tpu_custom_call.1
= control target key start
LH: loop header
LB: loop body
LE: loop exit
PB: predicated region body
PF: predicated region fallthrough
CT: control target
= control target key end

     0   :  { %s312_s0 = inlined_call_operand.vmem [shape: f32[16,32], index: 0, kind: input, shape index: {}]   ;;  %s313_s1 = inlined_call_operand.vmem [shape: f32[32,128], index: 1, kind: input, shape index: {}]   ;;  %s314_s2 = inlined_call_operand.vmem [shape: f32[64,32], index: 2, kind: input, shape index: {}]   ;;  %s315_s3 = inlined_call_operand.hbm [shape: f32[16,32], index: 3, kind: output, shape index: {}]  }
   0x1   :  { %v27_v0 = vld [vmem:[%s313_s1 + $0x18] sm:$0xff]  ;;  %v26_v1 = vld [vmem:[%s313_s1 + $0x10] sm:$0xff]  ;;  %v25_v2 = vld [vmem:[%s313_s1 + $0x8] sm:$0xff] }
   0x2   :  { %47 = vmatpush.msra.mxu0 %v27_v0  ;;  %183 = vmatpush.msra.mxu3 %v27_v0 }
   0x3   :  { %8 = vsyncpa [#allocation4], 0  ;;  %v24_v3 = vld [vmem:[%s313_s1] sm:$0xff]  ;;  %vm19_vm0 = vcmask 261120   ;;  %v23_v5 = vld [vmem:[%s312_s0 + $0x8] sm:$0xff]  ;;  %v235_v24 = vmov 0.0  }
   0x4   :  { %48 = vmatpush.msra.mxu0 %v26_v1  ;;  %184 = vmatpush.msra.mxu3 %v26_v1  ;;  %v22_v4 = vld [vmem:[%s312_s0] sm:$0xff]  ;;  %v117_v6 = vld [vmem:[%s314_s2 + $0x38] sm:$0xff]  ;;  %v116_v7 = vld [vmem:[%s314_s2 + $0x30] sm:$0xff]  ;;  %s234_s0 = smov 64   ;;  %21 = vst.msk [vmem:[#allocation2 + $0x8] sm:$0xff] %vm19_vm0, %v235_v24  ;;  %vm118_vm8 = vcmask 523264  }
   0x5   :  { %187 = vmatpush.msra.mxu2 %v117_v6  ;;  %133 = vmatpush.msra.mxu1 %v117_v6  ;;  %v115_v8 = vld [vmem:[%s314_s2 + $0x28] sm:$0xff]  ;;  %v114_v10 = vld [vmem:[%s314_s2 + $0x20] sm:$0xff]  ;;  %v113_v11 = vld [vmem:[%s314_s2 + $0x18] sm:$0xff]  ;;  %20 = vst.msk [vmem:[#allocation2] sm:$0xff] %vm19_vm0, %v235_v24  ;;  %s165_s15 = sshll.u32 %s315_s3, 4  ;;  %s237_s16 = smov 128   ;;  %s166_s15 = int_to_ptr.hbm [resolvable:$true] %s165_s15 }
   0x6   :  { %49 = vmatpush.msra.mxu0 %v25_v2  ;;  %185 = vmatpush.msra.mxu3 %v25_v2  ;;  %v112_v12 = vld [vmem:[%s314_s2 + $0x10] sm:$0xff]  ;;  %v111_v13 = vld [vmem:[%s314_s2 + $0x8] sm:$0xff]  ;;  %v110_v20 = vld [vmem:[%s314_s2] sm:$0xff]  ;;  %s236_s2 = smov [#allocation3]   ;;  %s238_s17 = smov 8  }
   0x7   :  { %188 = vmatpush.msra.mxu2 %v116_v7  ;;  %134 = vmatpush.msra.mxu1 %v116_v7  ;;  %s163_s12 = sshll.u32 %s236_s2, 4  ;;  %s164_s12 = int_to_ptr.vmem [resolvable:$true] %s163_s12 }
   0x8   :  { %50 = vmatpush.msra.mxu0 %v24_v3  ;;  %186 = vmatpush.msra.mxu3 %v24_v3 }
   0x9   :  { %177 = vmatmul.msk.f32.vlgmr.msra.gmra.mxu0 %vm19_vm0, %v22_v4  ;;  %178 = vmatmul.msk.f32.vlgmr.msra.gmra.mxu3 %vm19_vm0, %v23_v5 }
   0xa   :  { %189 = vmatpush.msra.mxu2 %v115_v8  ;;  %135 = vmatpush.msra.mxu1 %v115_v8 }
   0xb   :  { %v109_v49 = vld [vmem:[#allocation2 + $0x8] sm:$0xff] }
   0xc   :  { %190 = vmatpush.msra.mxu2 %v114_v10  ;;  %136 = vmatpush.msra.mxu1 %v114_v10  ;;  %v108_v51 = vld [vmem:[#allocation2] sm:$0xff] }
   0xe   :  { %191 = vmatpush.msra.mxu2 %v113_v11  ;;  %137 = vmatpush.msra.mxu1 %v113_v11 }
  0x10   :  { %192 = vmatpush.msra.mxu2 %v112_v12  ;;  %138 = vmatpush.msra.mxu1 %v112_v12 }
  0x12   :  { %193 = vmatpush.msra.mxu2 %v111_v13  ;;  %139 = vmatpush.msra.mxu1 %v111_v13 }
  0x14   :  { %194 = vmatpush.msra.mxu2 %v110_v20  ;;  %140 = vmatpush.msra.mxu1 %v110_v20 }
  0x86   :  { %v52_v14 = vpop.f32.mrf.mxu0 }
  0x87   :  { %v179_v16 = vmul.f32 -1.442695, %v52_v14 }
  0x8c   :  { %v55_v9 = vpop.f32.mrf.mxu3 }
  0x8d   :  { %102 = vrot.lane.b32.xlu0 %v55_v9, %s234_s0  ;;  %v180_v15 = vmul.f32 -1.442695, %v55_v9 }
  0x8f   :  { %200 = vpow2.f32 %v180_v15 }
  0x90   :  { %202 = vpow2.f32 %v179_v16 }
  0x95   :  { %100 = vrot.lane.b32.xlu0 %v52_v14, %s234_s0  ;;  %v201_v17 = vpop.eup %200 }
  0x96   :  { %v65_v18 = vadd.f32 1.0, %v201_v17  ;;  %v203_v19 = vpop.eup %202 }
  0x97   :  { %v64_v21 = vadd.f32 1.0, %v203_v19 }
  0x98   :  { %204 = vrcp.f32 %v65_v18  ;;  %v92_v31 = vand.u32 2147483648, %v65_v18  ;;  %vm86_vm2 = vweird.f32 %v65_v18  ;;  %v90_v32 = vand.u32 2147483647, %v65_v18 }
  0x99   :  { %206 = vrcp.f32 %v64_v21  ;;  %vm71_vm4 = vweird.f32 %v64_v21  ;;  %v77_v36 = vand.u32 2147483648, %v64_v21  ;;  %v75_v39 = vand.u32 2147483647, %v64_v21 }
  0x9a   :  { %v93_v35 = vor.u32 1.1754944e-38, %v92_v31  ;;  %vm91_vm6 = vcmp.eq.f32.partialorder %v90_v32, 8.507059e+37 }
  0x9b   :  { %v78_v41 = vor.u32 1.1754944e-38, %v77_v36  ;;  %vm76_vm9 = vcmp.eq.f32.partialorder %v75_v39, 8.507059e+37 }
  0x9e   :  { %v205_v22 = vpop.eup %204 }
  0x9f   :  { %v82_v23 = vmul.f32 %v205_v22, %v65_v18  ;;  %v207_v26 = vpop.eup %206  ;;  %vm87_vm1 = vweird.f32 %v205_v22 }
  0xa0   :  { %v67_v27 = vmul.f32 %v207_v26, %v64_v21  ;;  %vm88_vm3 = vmor %vm86_vm2, %vm87_vm1  ;;  %vm72_vm5 = vweird.f32 %v207_v26 }
  0xa1   :  { %v83_v25 = vsub.f32 1.0, %v82_v23  ;;  %vm73_vm7 = vmor %vm71_vm4, %vm72_vm5 }
  0xa2   :  { %v68_v29 = vsub.f32 1.0, %v67_v27 }
  0xa3   :  { %v84_v28 = vmul.f32 %v205_v22, %v83_v25 }
  0xa4   :  { %v69_v33 = vmul.f32 %v207_v26, %v68_v29 }
  0xa5   :  { %v85_v30 = vadd.f32 %v205_v22, %v84_v28 }
  0xa6   :  { %v70_v38 = vadd.f32 %v207_v26, %v69_v33 }
  0xa7   :  { %v89_v34 = vsel %vm88_vm3, %v205_v22, %v85_v30 }
  0xa8   :  { %v94_v37 = vsel %vm91_vm6, %v93_v35, %v89_v34  ;;  %v74_v43 = vsel %vm73_vm7, %v207_v26, %v70_v38 }
  0xa9   :  { %v97_v40 = vmul.f32 %v94_v37, %v55_v9  ;;  %v79_v45 = vsel %vm76_vm9, %v78_v41, %v74_v43 }
  0xaa   :  { %v96_v46 = vmul.f32 %v79_v45, %v52_v14 }
  0xff   :  { %v103_v42 = vpop.permute.xlu0 %102 }
 0x100   :  { %v107_v44 = vmul.f32 %v103_v42, %v97_v40 }
 0x102   :  { %182 = vmatmul.msk.f32.vlgmr.msra.gmra.mxu2 %vm118_vm8, %v107_v44 }
 0x107   :  { %v101_v47 = vpop.permute.xlu0 %100 }
 0x108   :  { %v106_v48 = vmul.f32 %v101_v47, %v96_v46 }
 0x10a   :  { %181 = vmatmul.msk.f32.vlgmr.msra.gmra.mxu1 %vm118_vm8, %v106_v48 }
 0x185   :  { %v145_v50 = vpop.f32.mrf.mxu2 }
 0x186   :  { %v149_v52 = vadd.f32 %v145_v50, %v109_v49 }
 0x187   :  { %v142_v53 = vpop.f32.mrf.mxu1 }
 0x188   :  { %151 = vst.msk [vmem:[#allocation2 + $0x8] sm:$0xff] %vm19_vm0, %v149_v52  ;;  %v148_v54 = vadd.f32 %v142_v53, %v108_v51 }
 0x18a   :  { %150 = vst.msk [vmem:[#allocation2] sm:$0xff] %vm19_vm0, %v148_v54 }
 0x18f   :  { %v156_v55 = vld [vmem:[#allocation2 + $0x8] sm:$0xff] }
 0x190   :  { %158 = vst.msk [vmem:[#allocation3 + $0x8] sm:$0xff] %vm19_vm0, %v156_v55 }
 0x191   :  { %v155_v56 = vld [vmem:[#allocation2] sm:$0xff] }
 0x192   :  { %157 = vst.msk [vmem:[#allocation3] sm:$0xff] %vm19_vm0, %v155_v56 }
 0x193   :  { %171 = dma.vmem_to_hbm [thread:$0]  %s164_s12, 256, %s166_s15, [#allocation4], %s237_s16, %s237_s16, %s238_s17  }
 0x194   :  { %232 = dma.done.wait [#allocation4], 256  }
 0x195   :  { %233 = vsyncadd [#allocation4], 4294967040 }
 0x196   :  { %176 = vsyncpa [#allocation4], 1 }

</bundles_post_ra>
